<compile_context>
chip_gen: v6e
topology: v6e:2x2x1
jax: 0.10.0
libtpu: 0.0.40
codegen_flags: <defaults>
</compile_context>

<pallas_src>
import functools

import jax
import jax.numpy as jnp
import numpy as np
from jax import lax
from jax.experimental import pallas as pl
from jax.experimental.pallas import tpu as pltpu

LANE = 128
SUB_ROWS = 128  # in-kernel sub-tile height (physical rows)


def _round_up(v, m):
    return (v + m - 1) // m * m


def networkm4_kernel(x_ref, wuvh_ref, buvh_ref, wl_ref, bl_ref,
                     wlast_ref, blast_ref, out_ref, *,
                     num_hidden, dp, sub, n_sub):
    def process(r0):
        x = x_ref[pl.ds(r0, sub), :]                         # [sub, pack*in]

        # Fused U/V/H input projection: one MXU pass, one bias add, one tanh.
        uvh = jnp.tanh(jnp.dot(x, wuvh_ref[...],
                               preferred_element_type=jnp.float32)
                       + buvh_ref[...])                      # [sub, 3*dp]
        U = uvh[:, 0:dp]             # 128-aligned lane slices: no XLU shuffle
        V = uvh[:, dp:2 * dp]
        H = uvh[:, 2 * dp:3 * dp]
        D = V - U                    # hoisted: gate update becomes U + Z*D

        # Static unroll over the hidden layers: Linear step then Tanh step,
        # each followed by the gate update (exactly the PyTorch Sequential).
        for i in range(num_hidden):
            Z = (jnp.dot(H, wl_ref[i], preferred_element_type=jnp.float32)
                 + bl_ref[i])
            H = U + Z * D
            Z = jnp.tanh(H)
            H = U + Z * D

        out_ref[pl.ds(r0, sub), :] = (
            jnp.dot(H, wlast_ref[...], preferred_element_type=jnp.float32)
            + blast_ref[...])

    if n_sub == 1:
        process(0)
    else:
        # Rolled loop bounds the live range of each sub-tile's activations
        # (keeps the working set ~64 vregs instead of spilling).
        def loop_body(s, carry):
            process(pl.multiple_of(s * sub, sub))
            return carry

        lax.fori_loop(0, n_sub, loop_body, 0)


def pack_params(params, lane=LANE):
    """Pack `pack` logical rows per physical lane-row via block-diagonal weights.

    With dim=40, pack=3 so 120 of 128 lanes carry data.  Padded lanes stay
    exactly zero through the whole recurrence (tanh(0)=0, zero weights/biases),
    and the block-diagonal structure prevents any cross-talk between the
    logical rows sharing a physical row, so results are unchanged.
    """
    input_dim, dim = params["Wu"].shape
    out_dim = params["Wlast"].shape[1]
    L = params["Wl"].shape[0]
    pack = max(1, lane // dim)                 # logical rows per physical row
    dp = _round_up(pack * dim, lane)

    def bdiag_in(W):                           # [in, dim] -> [pack*in, dp]
        out = jnp.zeros((pack * input_dim, dp), W.dtype)
        for j in range(pack):
            out = out.at[j * input_dim:(j + 1) * input_dim,
                         j * dim:(j + 1) * dim].set(W)
        return out

    def bdiag_hid(W):                          # [dim, dim] -> [dp, dp]
        out = jnp.zeros((dp, dp), W.dtype)
        for j in range(pack):
            out = out.at[j * dim:(j + 1) * dim,
                         j * dim:(j + 1) * dim].set(W)
        return out

    def bdiag_out(W):                          # [dim, out] -> [dp, pack*out]
        out = jnp.zeros((dp, pack * out_dim), W.dtype)
        for j in range(pack):
            out = out.at[j * dim:(j + 1) * dim,
                         j * out_dim:(j + 1) * out_dim].set(W)
        return out

    def tile_bias(b):                          # [1, dim] -> [1, dp]
        return jnp.pad(jnp.tile(b, (1, pack)),
                       ((0, 0), (0, dp - pack * dim)))

    Wuvh = jnp.concatenate([bdiag_in(params["Wu"]), bdiag_in(params["Wv"]),
                            bdiag_in(params["Wh"])], axis=-1)   # [pack*in, 3*dp]
    buvh = jnp.concatenate([tile_bias(params["bu"]), tile_bias(params["bv"]),
                            tile_bias(params["bh"])], axis=-1)  # [1, 3*dp]
    Wl = jnp.stack([bdiag_hid(params["Wl"][i]) for i in range(L)], 0)  # [L,dp,dp]
    bl = jnp.stack([tile_bias(params["bl"][i]) for i in range(L)], 0)  # [L,1,dp]
    Wlast = bdiag_out(params["Wlast"])                          # [dp, pack*out]
    blast = jnp.tile(params["blast"], (1, pack))                # [1, pack*out]

    return dict(Wuvh=Wuvh, buvh=buvh, Wl=Wl, bl=bl, Wlast=Wlast, blast=blast,
                dim=dim, dp=dp, pack=pack, input_dim=input_dim,
                out_dim=out_dim)


def networkm4_forward(x, params, *, tile_n=512):
    """x: [N, input_dim] f32. params: dict of f32 arrays (see init_params)."""
    n, input_dim = x.shape
    packed = pack_params(params)
    pack, dp = packed["pack"], packed["dp"]
    out_dim = packed["out_dim"]
    L = packed["Wl"].shape[0]

    # ---- pack `pack` logical rows into each physical lane-row ----
    n_grp = _round_up(n, pack)
    if n_grp != n:
        x = jnp.pad(x, ((0, n_grp - n), (0, 0)))
    m = n_grp // pack                                   # physical rows
    xp = x.reshape(m, pack * input_dim)

    # ---- batch tiling ----
    # Large grid tiles (amortize per-step overhead) walked in 128-row
    # sub-tiles inside the kernel (bounded vreg pressure); cap the tile so the
    # grid has >= 2 steps whenever possible (v7x megacore sharding).
    tile = _round_up(min(tile_n, max(pl.cdiv(m, 2), 8)), 8)
    if tile > SUB_ROWS:
        tile = _round_up(tile, SUB_ROWS)
    sub = min(tile, SUB_ROWS)
    n_sub = tile // sub
    m_pad = _round_up(m, tile)
    if m_pad != m:
        xp = jnp.pad(xp, ((0, m_pad - m), (0, 0)))
    grid = (m_pad // tile,)

    kernel = functools.partial(networkm4_kernel, num_hidden=L, dp=dp,
                               sub=sub, n_sub=n_sub)

    # Advisory cost estimate (actual packed/padded work executed).
    param_bytes = 4 * (packed["Wuvh"].size + packed["buvh"].size
                       + packed["Wl"].size + packed["bl"].size
                       + packed["Wlast"].size + packed["blast"].size)
    flops = 2 * m_pad * (pack * input_dim * 3 * dp + L * dp * dp
                         + dp * pack * out_dim)
    transcendentals = m_pad * dp * (3 + L)
    bytes_accessed = 4 * m_pad * pack * (input_dim + out_dim) + param_bytes

    outp = pl.pallas_call(
        kernel,
        out_shape=jax.ShapeDtypeStruct((m_pad, pack * out_dim), jnp.float32),
        grid=grid,
        in_specs=[
            pl.BlockSpec((tile, pack * input_dim), lambda i: (i, 0)),   # x: streamed
            pl.BlockSpec((pack * input_dim, 3 * dp), lambda i: (0, 0)),  # Wuvh resident
            pl.BlockSpec((1, 3 * dp), lambda i: (0, 0)),
            pl.BlockSpec((L, dp, dp), lambda i: (0, 0, 0)),              # hidden weights
            pl.BlockSpec((L, 1, dp), lambda i: (0, 0, 0)),
            pl.BlockSpec((dp, pack * out_dim), lambda i: (0, 0)),
            pl.BlockSpec((1, pack * out_dim), lambda i: (0, 0)),
        ],
        out_specs=pl.BlockSpec((tile, pack * out_dim), lambda i: (i, 0)),
        compiler_params=pltpu.CompilerParams(
            dimension_semantics=("parallel",)),
        cost_estimate=pl.CostEstimate(flops=flops,
                                      transcendentals=transcendentals,
                                      bytes_accessed=bytes_accessed),
    )(xp, packed["Wuvh"], packed["buvh"], packed["Wl"], packed["bl"],
      packed["Wlast"], packed["blast"])

    # Unpack: [m_pad, pack*out] -> [m_pad*pack, out], drop padded rows.
    return outp.reshape(m_pad * pack, out_dim)[:n]


def init_params(key, input_dim=2, output_dim=1, layers=(40, 40, 40, 40)):
    """Deterministic init mimicking torch.nn.Linear's U(-1/sqrt(fan_in), +...).

    Weights are stored already transposed to [in, out]; biases as [1, out]
    (and [L, 1, out] for the hidden stack) for TPU-friendly 2D layouts.
    """
    dim = layers[0]
    L = len(layers)

    def linear(key, fan_in, fan_out):
        kw, kb = jax.random.split(key)
        bound = 1.0 / np.sqrt(fan_in)
        W = jax.random.uniform(kw, (fan_in, fan_out), jnp.float32, -bound, bound)
        b = jax.random.uniform(kb, (1, fan_out), jnp.float32, -bound, bound)
        return W, b

    keys = jax.random.split(key, 4 + L)
    Wu, bu = linear(keys[0], input_dim, dim)
    Wv, bv = linear(keys[1], input_dim, dim)
    Wh, bh = linear(keys[2], input_dim, dim)
    Wlast, blast = linear(keys[3], dim, output_dim)

    Wl_list, bl_list = [], []
    for i in range(L):
        W, b = linear(keys[4 + i], dim, dim)
        Wl_list.append(W)
        bl_list.append(b[None])          # [1, 1, dim]
    Wl = jnp.stack(Wl_list, axis=0)      # [L, dim, dim]
    bl = jnp.concatenate(bl_list, 0)     # [L, 1, dim]

    return dict(Wu=Wu, bu=bu, Wv=Wv, bv=bv, Wh=Wh, bh=bh,
                Wl=Wl, bl=bl, Wlast=Wlast, blast=blast)


def networkm4_reference(x, params):
    """Pure-JAX reference of the PyTorch forward (full-precision matmuls)."""
    hi = jax.lax.Precision.HIGHEST
    U = jnp.tanh(jnp.dot(x, params["Wu"], precision=hi) + params["bu"])
    V = jnp.tanh(jnp.dot(x, params["Wv"], precision=hi) + params["bv"])
    H = jnp.tanh(jnp.dot(x, params["Wh"], precision=hi) + params["bh"])
    L = params["Wl"].shape[0]
    for i in range(L):
        Z = jnp.dot(H, params["Wl"][i], precision=hi) + params["bl"][i]
        H = (1.0 - Z) * U + Z * V
        Z = jnp.tanh(H)
        H = (1.0 - Z) * U + Z * V
    return jnp.dot(H, params["Wlast"], precision=hi) + params["blast"]


if __name__ == "__main__":
    key = jax.random.PRNGKey(0)
    k_param, k_x = jax.random.split(key)

    input_dim, output_dim = 2, 1
    hidden_layers = (40, 40, 40, 40)

    params = init_params(k_param, input_dim, output_dim, hidden_layers)

    # Case 1: small batch, not divisible by the 3-row packing factor.
    x = jax.random.normal(k_x, (64, input_dim), dtype=jnp.float32)
    out = jax.block_until_ready(networkm4_forward(x, params))
    ref = jax.block_until_ready(networkm4_reference(x, params))
    np.testing.assert_allclose(np.asarray(out), np.asarray(ref),
                               rtol=1e-5, atol=1e-5)
    assert out.shape == (64, output_dim)

    # Case 2: non-divisible batch with a small tile -> multi-step grid
    # (exercises batch padding, resident weights across steps, >=2 grid steps).
    x2 = jax.random.normal(jax.random.PRNGKey(7), (40, input_dim),
                           dtype=jnp.float32)
    out2 = jax.block_until_ready(networkm4_forward(x2, params, tile_n=16))
    ref2 = jax.block_until_ready(networkm4_reference(x2, params))
    np.testing.assert_allclose(np.asarray(out2), np.asarray(ref2),
                               rtol=1e-5, atol=1e-5)
    assert out2.shape == (40, output_dim)

    # Case 3: larger batch exercising the in-kernel 128-row sub-tile loop
    # (n_sub > 1) plus padded physical rows.
    x3 = jax.random.normal(jax.random.PRNGKey(11), (1000, input_dim),
                           dtype=jnp.float32)
    out3 = jax.block_until_ready(networkm4_forward(x3, params))
    ref3 = jax.block_until_ready(networkm4_reference(x3, params))
    np.testing.assert_allclose(np.asarray(out3), np.asarray(ref3),
                               rtol=1e-5, atol=1e-5)
    assert out3.shape == (1000, output_dim)

    print("KERNEL_OK")
</pallas_src>

<mosaic_0001>
module attributes {stable_mosaic.version = 11 : i64} {
  func.func @networkm4_kernel(%arg0: i32, %arg1: memref<16x6xf32, #tpu.memory_space<vmem>>, %arg2: memref<6x384xf32, #tpu.memory_space<vmem>>, %arg3: memref<1x384xf32, #tpu.memory_space<vmem>>, %arg4: memref<4x128x128xf32, #tpu.memory_space<vmem>>, %arg5: memref<4x1x128xf32, #tpu.memory_space<vmem>>, %arg6: memref<128x3xf32, #tpu.memory_space<vmem>>, %arg7: memref<1x3xf32, #tpu.memory_space<vmem>>, %arg8: memref<16x3xf32, #tpu.memory_space<vmem>>) attributes {dimension_semantics = [#tpu.dimension_semantics<parallel>], iteration_bounds = array<i64: 2>, scalar_prefetch = 0 : i64, scratch_operands = 0 : i64, tpu.core_type = #tpu.core_type<tc>, window_params = [{transform_indices = @transform_0, window_bounds = array<i64: 16, 6>}, {pipeline_mode = #tpu.pipeline_mode<synchronous>, transform_indices = @transform_1, window_bounds = array<i64: 6, 384>}, {pipeline_mode = #tpu.pipeline_mode<synchronous>, transform_indices = @transform_2, window_bounds = array<i64: 1, 384>}, {pipeline_mode = #tpu.pipeline_mode<synchronous>, transform_indices = @transform_3, window_bounds = array<i64: 4, 128, 128>}, {pipeline_mode = #tpu.pipeline_mode<synchronous>, transform_indices = @transform_4, window_bounds = array<i64: 4, 1, 128>}, {pipeline_mode = #tpu.pipeline_mode<synchronous>, transform_indices = @transform_5, window_bounds = array<i64: 128, 3>}, {pipeline_mode = #tpu.pipeline_mode<synchronous>, transform_indices = @transform_6, window_bounds = array<i64: 1, 3>}, {transform_indices = @transform_7, window_bounds = array<i64: 16, 3>}]} {
    %c0 = arith.constant 0 : index
    %c0_0 = arith.constant 0 : index
    %0 = vector.load %arg1[%c0, %c0_0] : memref<16x6xf32, #tpu.memory_space<vmem>>, vector<16x6xf32>
    %c0_1 = arith.constant 0 : index
    %c0_2 = arith.constant 0 : index
    %1 = vector.load %arg2[%c0_1, %c0_2] : memref<6x384xf32, #tpu.memory_space<vmem>>, vector<6x384xf32>
    %cst = arith.constant dense<0.000000e+00> : vector<16x384xf32>
    %2 = tpu.matmul %0, %1, %cst {dimension_numbers = #tpu.dot_dimension_numbers<[1], [0], [0], [1], [0, 0, 1, 1], [], []>} : vector<16x6xf32>, vector<6x384xf32>, vector<16x384xf32> -> vector<16x384xf32>
    %c0_3 = arith.constant 0 : index
    %c0_4 = arith.constant 0 : index
    %3 = vector.load %arg3[%c0_3, %c0_4] : memref<1x384xf32, #tpu.memory_space<vmem>>, vector<1x384xf32>
    %4 = vector.broadcast %3 : vector<1x384xf32> to vector<16x384xf32>
    %5 = arith.addf %2, %4 : vector<16x384xf32>
    %6 = math.tanh %5 : vector<16x384xf32>
    %7 = vector.extract_strided_slice %6 {offsets = [0, 0], sizes = [16, 128], strides = [1, 1]} : vector<16x384xf32> to vector<16x128xf32>
    %8 = vector.extract_strided_slice %6 {offsets = [0, 128], sizes = [16, 128], strides = [1, 1]} : vector<16x384xf32> to vector<16x128xf32>
    %9 = vector.extract_strided_slice %6 {offsets = [0, 256], sizes = [16, 128], strides = [1, 1]} : vector<16x384xf32> to vector<16x128xf32>
    %10 = arith.subf %8, %7 : vector<16x128xf32>
    %c0_5 = arith.constant 0 : index
    %c0_6 = arith.constant 0 : index
    %c0_7 = arith.constant 0 : index
    %11 = vector.load %arg4[%c0_5, %c0_6, %c0_7] : memref<4x128x128xf32, #tpu.memory_space<vmem>>, vector<1x128x128xf32>
    %12 = vector.shape_cast %11 : vector<1x128x128xf32> to vector<128x128xf32>
    %cst_8 = arith.constant dense<0.000000e+00> : vector<16x128xf32>
    %13 = tpu.matmul %9, %12, %cst_8 {dimension_numbers = #tpu.dot_dimension_numbers<[1], [0], [0], [1], [0, 0, 1, 1], [], []>} : vector<16x128xf32>, vector<128x128xf32>, vector<16x128xf32> -> vector<16x128xf32>
    %c0_9 = arith.constant 0 : index
    %c0_10 = arith.constant 0 : index
    %c0_11 = arith.constant 0 : index
    %14 = vector.load %arg5[%c0_9, %c0_10, %c0_11] : memref<4x1x128xf32, #tpu.memory_space<vmem>>, vector<1x1x128xf32>
    %15 = vector.shape_cast %14 : vector<1x1x128xf32> to vector<1x128xf32>
    %16 = vector.broadcast %15 : vector<1x128xf32> to vector<16x128xf32>
    %17 = arith.addf %13, %16 : vector<16x128xf32>
    %18 = arith.mulf %17, %10 : vector<16x128xf32>
    %19 = arith.addf %7, %18 : vector<16x128xf32>
    %20 = math.tanh %19 : vector<16x128xf32>
    %21 = arith.mulf %20, %10 : vector<16x128xf32>
    %22 = arith.addf %7, %21 : vector<16x128xf32>
    %c1 = arith.constant 1 : index
    %c0_12 = arith.constant 0 : index
    %c0_13 = arith.constant 0 : index
    %23 = vector.load %arg4[%c1, %c0_12, %c0_13] : memref<4x128x128xf32, #tpu.memory_space<vmem>>, vector<1x128x128xf32>
    %24 = vector.shape_cast %23 : vector<1x128x128xf32> to vector<128x128xf32>
    %cst_14 = arith.constant dense<0.000000e+00> : vector<16x128xf32>
    %25 = tpu.matmul %22, %24, %cst_14 {dimension_numbers = #tpu.dot_dimension_numbers<[1], [0], [0], [1], [0, 0, 1, 1], [], []>} : vector<16x128xf32>, vector<128x128xf32>, vector<16x128xf32> -> vector<16x128xf32>
    %c1_15 = arith.constant 1 : index
    %c0_16 = arith.constant 0 : index
    %c0_17 = arith.constant 0 : index
    %26 = vector.load %arg5[%c1_15, %c0_16, %c0_17] : memref<4x1x128xf32, #tpu.memory_space<vmem>>, vector<1x1x128xf32>
    %27 = vector.shape_cast %26 : vector<1x1x128xf32> to vector<1x128xf32>
    %28 = vector.broadcast %27 : vector<1x128xf32> to vector<16x128xf32>
    %29 = arith.addf %25, %28 : vector<16x128xf32>
    %30 = arith.mulf %29, %10 : vector<16x128xf32>
    %31 = arith.addf %7, %30 : vector<16x128xf32>
    %32 = math.tanh %31 : vector<16x128xf32>
    %33 = arith.mulf %32, %10 : vector<16x128xf32>
    %34 = arith.addf %7, %33 : vector<16x128xf32>
    %c2 = arith.constant 2 : index
    %c0_18 = arith.constant 0 : index
    %c0_19 = arith.constant 0 : index
    %35 = vector.load %arg4[%c2, %c0_18, %c0_19] : memref<4x128x128xf32, #tpu.memory_space<vmem>>, vector<1x128x128xf32>
    %36 = vector.shape_cast %35 : vector<1x128x128xf32> to vector<128x128xf32>
    %cst_20 = arith.constant dense<0.000000e+00> : vector<16x128xf32>
    %37 = tpu.matmul %34, %36, %cst_20 {dimension_numbers = #tpu.dot_dimension_numbers<[1], [0], [0], [1], [0, 0, 1, 1], [], []>} : vector<16x128xf32>, vector<128x128xf32>, vector<16x128xf32> -> vector<16x128xf32>
    %c2_21 = arith.constant 2 : index
    %c0_22 = arith.constant 0 : index
    %c0_23 = arith.constant 0 : index
    %38 = vector.load %arg5[%c2_21, %c0_22, %c0_23] : memref<4x1x128xf32, #tpu.memory_space<vmem>>, vector<1x1x128xf32>
    %39 = vector.shape_cast %38 : vector<1x1x128xf32> to vector<1x128xf32>
    %40 = vector.broadcast %39 : vector<1x128xf32> to vector<16x128xf32>
    %41 = arith.addf %37, %40 : vector<16x128xf32>
    %42 = arith.mulf %41, %10 : vector<16x128xf32>
    %43 = arith.addf %7, %42 : vector<16x128xf32>
    %44 = math.tanh %43 : vector<16x128xf32>
    %45 = arith.mulf %44, %10 : vector<16x128xf32>
    %46 = arith.addf %7, %45 : vector<16x128xf32>
    %c3 = arith.constant 3 : index
    %c0_24 = arith.constant 0 : index
    %c0_25 = arith.constant 0 : index
    %47 = vector.load %arg4[%c3, %c0_24, %c0_25] : memref<4x128x128xf32, #tpu.memory_space<vmem>>, vector<1x128x128xf32>
    %48 = vector.shape_cast %47 : vector<1x128x128xf32> to vector<128x128xf32>
    %cst_26 = arith.constant dense<0.000000e+00> : vector<16x128xf32>
    %49 = tpu.matmul %46, %48, %cst_26 {dimension_numbers = #tpu.dot_dimension_numbers<[1], [0], [0], [1], [0, 0, 1, 1], [], []>} : vector<16x128xf32>, vector<128x128xf32>, vector<16x128xf32> -> vector<16x128xf32>
    %c3_27 = arith.constant 3 : index
    %c0_28 = arith.constant 0 : index
    %c0_29 = arith.constant 0 : index
    %50 = vector.load %arg5[%c3_27, %c0_28, %c0_29] : memref<4x1x128xf32, #tpu.memory_space<vmem>>, vector<1x1x128xf32>
    %51 = vector.shape_cast %50 : vector<1x1x128xf32> to vector<1x128xf32>
    %52 = vector.broadcast %51 : vector<1x128xf32> to vector<16x128xf32>
    %53 = arith.addf %49, %52 : vector<16x128xf32>
    %54 = arith.mulf %53, %10 : vector<16x128xf32>
    %55 = arith.addf %7, %54 : vector<16x128xf32>
    %56 = math.tanh %55 : vector<16x128xf32>
    %57 = arith.mulf %56, %10 : vector<16x128xf32>
    %58 = arith.addf %7, %57 : vector<16x128xf32>
    %c0_30 = arith.constant 0 : index
    %c0_31 = arith.constant 0 : index
    %59 = vector.load %arg6[%c0_30, %c0_31] : memref<128x3xf32, #tpu.memory_space<vmem>>, vector<128x3xf32>
    %cst_32 = arith.constant dense<0.000000e+00> : vector<16x3xf32>
    %60 = tpu.matmul %58, %59, %cst_32 {dimension_numbers = #tpu.dot_dimension_numbers<[1], [0], [0], [1], [0, 0, 1, 1], [], []>} : vector<16x128xf32>, vector<128x3xf32>, vector<16x3xf32> -> vector<16x3xf32>
    %c0_33 = arith.constant 0 : index
    %c0_34 = arith.constant 0 : index
    %61 = vector.load %arg7[%c0_33, %c0_34] : memref<1x3xf32, #tpu.memory_space<vmem>>, vector<1x3xf32>
    %62 = vector.broadcast %61 : vector<1x3xf32> to vector<16x3xf32>
    %63 = arith.addf %60, %62 : vector<16x3xf32>
    %c0_35 = arith.constant 0 : index
    %c0_36 = arith.constant 0 : index
    %64 = vector.load %arg8[%c0_35, %c0_36] : memref<16x3xf32, #tpu.memory_space<vmem>>, vector<16x3xf32>
    tpu.vector_store %arg8[%c0_35, %c0_36], %63 {strides = array<i32>} : memref<16x3xf32, #tpu.memory_space<vmem>>, vector<16x3xf32>,
    return
  }
  func.func @transform_0(%arg0: i32) -> (i32, i32) {
    %c0_i32 = arith.constant 0 : i32
    %c0_i32_0 = arith.constant 0 : i32
    return %arg0, %c0_i32 : i32, i32
  }
  func.func @transform_1(%arg0: i32) -> (i32, i32) {
    %c0_i32 = arith.constant 0 : i32
    %c0_i32_0 = arith.constant 0 : i32
    %c0_i32_1 = arith.constant 0 : i32
    return %c0_i32, %c0_i32_0 : i32, i32
  }
  func.func @transform_2(%arg0: i32) -> (i32, i32) {
    %c0_i32 = arith.constant 0 : i32
    %c0_i32_0 = arith.constant 0 : i32
    %c0_i32_1 = arith.constant 0 : i32
    return %c0_i32, %c0_i32_0 : i32, i32
  }
  func.func @transform_3(%arg0: i32) -> (i32, i32, i32) {
    %c0_i32 = arith.constant 0 : i32
    %c0_i32_0 = arith.constant 0 : i32
    %c0_i32_1 = arith.constant 0 : i32
    %c0_i32_2 = arith.constant 0 : i32
    return %c0_i32, %c0_i32_0, %c0_i32_1 : i32, i32, i32
  }
  func.func @transform_4(%arg0: i32) -> (i32, i32, i32) {
    %c0_i32 = arith.constant 0 : i32
    %c0_i32_0 = arith.constant 0 : i32
    %c0_i32_1 = arith.constant 0 : i32
    %c0_i32_2 = arith.constant 0 : i32
    return %c0_i32, %c0_i32_0, %c0_i32_1 : i32, i32, i32
  }
  func.func @transform_5(%arg0: i32) -> (i32, i32) {
    %c0_i32 = arith.constant 0 : i32
    %c0_i32_0 = arith.constant 0 : i32
    %c0_i32_1 = arith.constant 0 : i32
    return %c0_i32, %c0_i32_0 : i32, i32
  }
  func.func @transform_6(%arg0: i32) -> (i32, i32) {
    %c0_i32 = arith.constant 0 : i32
    %c0_i32_0 = arith.constant 0 : i32
    %c0_i32_1 = arith.constant 0 : i32
    return %c0_i32, %c0_i32_0 : i32, i32
  }
  func.func @transform_7(%arg0: i32) -> (i32, i32) {
    %c0_i32 = arith.constant 0 : i32
    %c0_i32_0 = arith.constant 0 : i32
    return %arg0, %c0_i32 : i32, i32
  }
}

</mosaic_0001>

<bundles_post_ra>
// kernel: tpu_custom_call.1
= control target key start
LH: loop header
LB: loop body
LE: loop exit
PB: predicated region body
PF: predicated region fallthrough
CT: control target
= control target key end

     0   :  { %12 = vsyncpa [#allocation3], 0  ;;  %s1536_s24 = smov 0   ;;  %s1724_s0 = inlined_call_operand.vmem [shape: f32[32,6], index: 0, kind: input, shape index: {}]   ;;  %s1725_s1 = inlined_call_operand.vmem [shape: f32[6,384], index: 1, kind: input, shape index: {}]   ;;  %s1726_s2 = inlined_call_operand.vmem [shape: f32[1,384], index: 2, kind: input, shape index: {}]   ;;  %s1727_s3 = inlined_call_operand.hbm [shape: f32[4,128,128], index: 3, kind: input, shape index: {}]   ;;  %s1728_s4 = inlined_call_operand.vmem [shape: f32[4,1,128], index: 4, kind: input, shape index: {}]   ;;  %s1729_s5 = inlined_call_operand.vmem [shape: f32[128,3], index: 5, kind: input, shape index: {}]   ;;  %s1730_s6 = inlined_call_operand.vmem [shape: f32[1,3], index: 6, kind: input, shape index: {}]   ;;  %s1731_s7 = inlined_call_operand.vmem [shape: f32[32,3], index: 7, kind: output, shape index: {}]  }
   0x1 LB: > { %s1103_s25 = sadd.s32 4294967295, %s1490_s24   ;;  %p1105_p0 = scmp.ge.s32.totalorder %s1490_s24, 1  ;;  %s1490_s24 = sphi %s1536_s24, %s18_s24  }
   0x2   : > { %p201_p1 = scmp.lt.s32.totalorder %s1490_s24, 3  ;;  %s1492_s26 = smov [#allocation2]  }
   0x3   : > { %s219_s27 = sshll.u32 %s1492_s26, 4  ;;  %p1548_p3 = scmp.eq.s32.totalorder %s1103_s25, 0  ;;  %s220_s27 = int_to_ptr.vmem [resolvable:$true] %s219_s27 }
   0x4   : > { %p1544_p2 = pnand %p1105_p0, %p201_p1  ;;  %s1465_s30 = scalar_lea.vmem %s220_s27, 8192 }
   0x5   : > { %p1466_p7 = scmp.ne.s32.totalorder %s220_s27, %s1465_s30  ;;  %p1473_p10 = scmp.lt.s32.totalorder %s220_s27, %s220_s27 }
   0x6   : > { %p1408_p4 = pneg %p1544_p2  ;;  %p1474_p11 = scmp.lt.s32.totalorder %s1465_s30, %s1465_s30 }
   0x8   : > { %p1409_p5 = pnand %p1548_p3, %p1408_p4  ;;  %p1475_p12 = por %p1474_p11, %p1473_p10 }
   0xa   : > { %p1456_p6 = pneg %p1409_p5 }
   0xc   : > { %p1468_p8 = pnand %p1466_p7, %p1456_p6 }
   0xe   : > { %p1469_p9 = pneg %p1468_p8 }
  0x10   : > { %p1476_p13 = pnand %p1475_p12, %p1469_p9 }
  0x12   : > { %1479 = shalt.err (!%p1476_p13)
}
  0x13   : > { %s1493_s8 = smov 128   ;;  %s1494_s9 = smov 8  }
  0x14   : > { %1411 = dma.hbm_to_vmem [thread:$0]  (!%p1409_p5), %s1727_s3, 8192, %s220_s27, [#allocation3], %s1493_s8, %s1493_s8, %s1494_s9  }
  0x15   : > { %253 = sbr.rel (%p1544_p2) target bundleno = 1332 (0x534), region = 48 }
  0x1a   : > { %1485 = dma.done.wait (%p1548_p3), [#allocation3], 8192  }
  0x1b   : > { %1487 = vsyncadd (%p1548_p3), [#allocation3], 4294959104  ;;  %s1110_s12 = sshll.u32 %s1103_s25, 1  ;;  %v1495_v0 = vmov 0.0   ;;  %vm326_vm0 = vcmask 1045504   ;;  %vm319_vm1 = vcmask 48128   ;;  %v304_v24 = vlaneseq }
  0x1c   : > { %400 = vmatprep.mubr.f32.mxu1 %v1495_v0  ;;  %p286_p0 = scmp.lt.s32.totalorder %s1110_s12, 3  ;;  %v300_v1 = vld [vmem:[%s1725_s1 + $0x8] sm:$0x3f]  ;;  %v299_v2 = vld [vmem:[%s1725_s1] sm:$0x3f]  ;;  %v511_v5 = vld [vmem:[#allocation2 + $0x78] sm:$0xff] }
  0x1d   : > { %1114 = vmatprep.subr.msk.mxu1 %vm326_vm0, %v300_v1  ;;  %v301_v4 = vld [vmem:[%s1725_s1 + $0x10] sm:$0x3f]  ;;  %1229 = vmatprep.subr.mxu0 %v511_v5  ;;  %v509_v8 = vld [vmem:[#allocation2 + $0x68] sm:$0xff]  ;;  %v508_v9 = vld [vmem:[#allocation2 + $0x60] sm:$0xff]  ;;  %v1586_v25 = vshrl.u32 %v304_v24, 7  ;;  %vm1032_vm2 = vcmask 23552  }
  0x1e   : > { %s1735_s12 = smov (!%p286_p0, %s1110_s12), 3  ;;  %1115 = vmatpush1.msk.msra.mxu1 %vm326_vm0, %v299_v2  ;;  %v510_v6 = vld [vmem:[#allocation2 + $0x70] sm:$0xff]  ;;  %1230 = vmatpush3.msra.mxu0 %v511_v5  ;;  %v507_v10 = vld [vmem:[#allocation2 + $0x58] sm:$0xff]  ;;  %v505_v12 = vld [vmem:[#allocation2 + $0x48] sm:$0xff] }
  0x1f   : > { %s1111_s13 = sshll.u32 %s1735_s12, 3  ;;  %1224 = vmatprep.subr.msk.mxu1 %vm326_vm0, %v301_v4  ;;  %1231 = vmatprep.subr.mxu0 %v510_v6  ;;  %v506_v11 = vld [vmem:[#allocation2 + $0x50] sm:$0xff]  ;;  %v504_v13 = vld [vmem:[#allocation2 + $0x40] sm:$0xff]  ;;  %v503_v14 = vld [vmem:[#allocation2 + $0x38] sm:$0xff]  ;;  %v314_v28 = vsub.s32 2, %v1586_v25  ;;  %v310_v55 = vsub.s32 1, %v1586_v25 }
  0x20   : > { %s289_s16 = scalar_lea.vmem %s1724_s0, %s1111_s13  ;;  %1232 = vmatpush3.msra.mxu0 %v510_v6  ;;  %v502_v15 = vld [vmem:[#allocation2 + $0x30] sm:$0xff]  ;;  %v501_v16 = vld [vmem:[#allocation2 + $0x28] sm:$0xff]  ;;  %v500_v17 = vld [vmem:[#allocation2 + $0x20] sm:$0xff]  ;;  %v306_v56 = vsub.s32 0, %v1586_v25  ;;  %s295_s30 = scalar_lea.vmem %s1731_s7, %s1111_s13 }
  0x21   : > { %v297_v3 = vld [vmem:[%s289_s16] sm:$0xff]  ;;  %v298_v7 = vld [vmem:[%s289_s16 + $0x8] sm:$0xff]  ;;  %1233 = vmatprep.subr.mxu0 %v509_v8  ;;  %v499_v18 = vld [vmem:[#allocation2 + $0x18] sm:$0xff] }
  0x22   : > { %1116 = vmatmul.mubr.msk.f32.vlgmr.msra.gmra.mxu1 %vm319_vm1, %v297_v3  ;;  %1234 = vmatpush3.msra.mxu0 %v509_v8  ;;  %v498_v19 = vld [vmem:[#allocation2 + $0x10] sm:$0xff]  ;;  %v497_v20 = vld [vmem:[#allocation2 + $0x8] sm:$0xff]  ;;  %v496_v21 = vld [vmem:[#allocation2] sm:$0xff] }
  0x23   : > { %1225 = vmatpush3.msk.msra.mxu1 %vm326_vm0, %v301_v4  ;;  %406 = vmatprep.mubr.f32.mxu1 %v1495_v0  ;;  %v620_v22 = vld [vmem:[#allocation2 + $0xf8] sm:$0xff]  ;;  %v619_v23 = vld [vmem:[#allocation2 + $0xf0] sm:$0xff]  ;;  %v1598_v30 = vld [vmem:[%s1726_s2] sm:$0x7] }
  0x24   : > { %1235 = vmatprep.subr.mxu0 %v508_v9  ;;  %1264 = vmatprep.subr.mxu1 %v620_v22  ;;  %v315_v32 = vrot.slane %v1598_v30, %v314_v28  ;;  %v618_v39 = vld [vmem:[#allocation2 + $0xe8] sm:$0xff]  ;;  %v617_v40 = vld [vmem:[#allocation2 + $0xe0] sm:$0xff]  ;;  %v616_v41 = vld [vmem:[#allocation2 + $0xd8] sm:$0xff]  ;;  %v311_v57 = vrot.slane %v1598_v30, %v310_v55  ;;  %v307_v58 = vrot.slane %v1598_v30, %v306_v56 }
  0x25   : > { %1236 = vmatpush3.msra.mxu0 %v508_v9  ;;  %v615_v42 = vld [vmem:[#allocation2 + $0xd0] sm:$0xff]  ;;  %v614_v43 = vld [vmem:[#allocation2 + $0xc8] sm:$0xff]  ;;  %v613_v44 = vld [vmem:[#allocation2 + $0xc0] sm:$0xff] }
  0x26   : > { %1117 = vmatmul.mubr.msk.f32.gmra.mxu1 %vm319_vm1, %v298_v7  ;;  %1237 = vmatprep.subr.mxu0 %v507_v10  ;;  %v612_v45 = vld [vmem:[#allocation2 + $0xb8] sm:$0xff]  ;;  %v611_v46 = vld [vmem:[#allocation2 + $0xb0] sm:$0xff]  ;;  %v610_v47 = vld [vmem:[#allocation2 + $0xa8] sm:$0xff] }
  0x27   : > { %1226 = vmatprep.mubr.msk.f32.mxu1 %vm319_vm1, %v297_v3  ;;  %1238 = vmatpush3.msra.mxu0 %v507_v10  ;;  %v609_v48 = vld [vmem:[#allocation2 + $0xa0] sm:$0xff]  ;;  %v608_v49 = vld [vmem:[#allocation2 + $0x98] sm:$0xff]  ;;  %v607_v50 = vld [vmem:[#allocation2 + $0x90] sm:$0xff] }
  0x28   : > { %1239 = vmatprep.subr.mxu0 %v506_v11  ;;  %v606_v51 = vld [vmem:[#allocation2 + $0x88] sm:$0xff]  ;;  %v605_v52 = vld [vmem:[#allocation2 + $0x80] sm:$0xff]  ;;  %v730_v53 = vld [vmem:[#allocation2 + $0x178] sm:$0xff] }
  0x29   : > { %1240 = vmatpush3.msra.mxu0 %v506_v11  ;;  %v729_v54 = vld [vmem:[#allocation2 + $0x170] sm:$0xff]  ;;  %v1121_v0 = vld [vmem:[%s1728_s4] ss:$0 sm:$0xff]  ;;  %v724_v24 = vld [vmem:[#allocation2 + $0x148] sm:$0xff] }
  0x2a   : > { %1227 = vmatmul.mubr.msk.f32.vlgmr.msra.gmra.mxu1 %vm319_vm1, %v298_v7  ;;  %1241 = vmatprep.subr.mxu0 %v505_v12  ;;  %v723_v25 = vld [vmem:[#allocation2 + $0x140] sm:$0xff]  ;;  %v720_v28 = vld [vmem:[#allocation2 + $0x128] sm:$0xff]  ;;  %v718_v30 = vld [vmem:[#allocation2 + $0x118] sm:$0xff] }
  0x2b   : > { %1242 = vmatpush3.msra.mxu0 %v505_v12  ;;  %1265 = vmatpush3.msra.mxu1 %v620_v22  ;;  %v726_v22 = vld [vmem:[#allocation2 + $0x158] sm:$0xff]  ;;  %v834_v55 = vld [vmem:[#allocation2 + $0x1c8] sm:$0xff]  ;;  %v833_v56 = vld [vmem:[#allocation2 + $0x1c0] sm:$0xff] }
  0x2c   : > { %1243 = vmatprep.subr.mxu0 %v504_v13  ;;  %1266 = vmatprep.subr.mxu1 %v619_v23 }
  0x2d   : > { %1244 = vmatpush3.msra.mxu0 %v504_v13  ;;  %1267 = vmatpush3.msra.mxu1 %v619_v23  ;;  %v725_v23 = vld [vmem:[#allocation2 + $0x150] sm:$0xff] }
  0x2e   : > { %1245 = vmatprep.subr.mxu0 %v503_v14  ;;  %1268 = vmatprep.subr.mxu1 %v618_v39 }
  0x2f   : > { %1246 = vmatpush3.msra.mxu0 %v503_v14  ;;  %1269 = vmatpush3.msra.mxu1 %v618_v39 }
  0x30   : > { %1247 = vmatprep.subr.mxu0 %v502_v15  ;;  %1270 = vmatprep.subr.mxu1 %v617_v40 }
  0x31   : > { %1248 = vmatpush3.msra.mxu0 %v502_v15  ;;  %1271 = vmatpush3.msra.mxu1 %v617_v40 }
  0x32   : > { %1249 = vmatprep.subr.mxu0 %v501_v16  ;;  %1272 = vmatprep.subr.mxu1 %v616_v41 }
  0x33   : > { %1250 = vmatpush3.msra.mxu0 %v501_v16  ;;  %1273 = vmatpush3.msra.mxu1 %v616_v41 }
  0x34   : > { %1251 = vmatprep.subr.mxu0 %v500_v17  ;;  %1274 = vmatprep.subr.mxu1 %v615_v42 }
  0x35   : > { %1252 = vmatpush3.msra.mxu0 %v500_v17  ;;  %1275 = vmatpush3.msra.mxu1 %v615_v42 }
  0x36   : > { %1253 = vmatprep.subr.mxu0 %v499_v18  ;;  %1276 = vmatprep.subr.mxu1 %v614_v43 }
  0x37   : > { %1254 = vmatpush3.msra.mxu0 %v499_v18  ;;  %1277 = vmatpush3.msra.mxu1 %v614_v43 }
  0x38   : > { %1255 = vmatprep.subr.mxu0 %v498_v19  ;;  %1278 = vmatprep.subr.mxu1 %v613_v44 }
  0x39   : > { %1256 = vmatpush3.msra.mxu0 %v498_v19  ;;  %1279 = vmatpush3.msra.mxu1 %v613_v44 }
  0x3a   : > { %1257 = vmatprep.subr.mxu0 %v497_v20  ;;  %1280 = vmatprep.subr.mxu1 %v612_v45 }
  0x3b   : > { %1258 = vmatpush3.msra.mxu0 %v497_v20  ;;  %1281 = vmatpush3.msra.mxu1 %v612_v45  ;;  %v728_v20 = vld [vmem:[#allocation2 + $0x168] sm:$0xff] }
  0x3c   : > { %1259 = vmatprep.subr.mxu0 %v496_v21  ;;  %1282 = vmatprep.subr.mxu1 %v611_v46 }
  0x3d   : > { %1260 = vmatpush3.msra.mxu0 %v496_v21  ;;  %1283 = vmatpush3.msra.mxu1 %v611_v46  ;;  %v727_v21 = vld [vmem:[#allocation2 + $0x160] sm:$0xff] }
  0x3e   : > { %1284 = vmatprep.subr.mxu1 %v610_v47  ;;  %1299 = vmatprep.subr.mxu0 %v730_v53 }
  0x3f   : > { %1285 = vmatpush3.msra.mxu1 %v610_v47 }
  0x40   : > { %1286 = vmatprep.subr.mxu1 %v609_v48 }
  0x41   : > { %1287 = vmatpush3.msra.mxu1 %v609_v48 }
  0x42   : > { %1288 = vmatprep.subr.mxu1 %v608_v49 }
  0x43   : > { %1289 = vmatpush3.msra.mxu1 %v608_v49 }
  0x44   : > { %1290 = vmatprep.subr.mxu1 %v607_v50 }
  0x45   : > { %1291 = vmatpush3.msra.mxu1 %v607_v50 }
  0x46   : > { %1292 = vmatprep.subr.mxu1 %v606_v51 }
  0x47   : > { %1293 = vmatpush3.msra.mxu1 %v606_v51  ;;  %v838_v51 = vld [vmem:[#allocation2 + $0x1e8] sm:$0xff] }
  0x48   : > { %1294 = vmatprep.subr.mxu1 %v605_v52 }
  0x49   : > { %1295 = vmatpush3.msra.mxu1 %v605_v52  ;;  %v837_v52 = vld [vmem:[#allocation2 + $0x1e0] sm:$0xff] }
  0xe2   : > { %v1588_v26 = vpop.f32.mrf.mxu1 }
  0xe3   : > { %v403_v62 = vadd.f32 %v1588_v26, %v307_v58  ;;  %v722_v26 = vld [vmem:[#allocation2 + $0x138] sm:$0xff] }
  0xe4   : > { %v1590_v27 = vpop.f32.mrf.mxu1 }
  0xe5   : > { %v405_v60 = vadd.f32 %v1590_v27, %v311_v57  ;;  %v721_v27 = vld [vmem:[#allocation2 + $0x130] sm:$0xff] }
  0xe6   : > { %v1593_v29 = vpop.f32.mrf.mxu1 }
  0xe7   : > { %v409_v61 = vadd.f32 %v1593_v29, %v307_v58  ;;  %v719_v29 = vld [vmem:[#allocation2 + $0x120] sm:$0xff]  ;;  %v831_v58 = vld [vmem:[#allocation2 + $0x1b0] sm:$0xff] }
  0xe8   : > { %v1600_v31 = vpop.f32.mrf.mxu1 }
  0xe9   : > { %v411_v59 = vadd.f32 %v1600_v31, %v311_v57  ;;  %v717_v31 = vld [vmem:[#allocation2 + $0x110] sm:$0xff]  ;;  %v832_v57 = vld [vmem:[#allocation2 + $0x1b8] sm:$0xff] }
  0xea   : > { %v1228_v33 = vpop.f32.mrf.mxu1 }
  0xeb   : > { %v485_v34 = vadd.f32 %v1228_v33, %v315_v32  ;;  %v715_v33 = vld [vmem:[#allocation2 + $0x100] sm:$0xff] }
  0xec   : > { %v479_v35 = vpop.f32.mrf.mxu1 }
  0xed   : > { %v480_v36 = vadd.f32 %v479_v35, %v315_v32  ;;  %v716_v32 = vld [vmem:[#allocation2 + $0x108] sm:$0xff]  ;;  %v839_v35 = vld [vmem:[#allocation2 + $0x1f0] sm:$0xff] }
  0xef   : > { %1426 = vtanh.f32 %v480_v36  ;;  %v1123_v36 = vld [vmem:[%s1728_s4 + $0x1] ss:$0 sm:$0xff] }
  0xf0   : > { %1428 = vtanh.f32 %v485_v34  ;;  %v840_v34 = vld [vmem:[#allocation2 + $0x1f8] sm:$0xff] }
  0xf1   : > { %1430 = vtanh.f32 %v411_v59  ;;  %1334 = vmatprep.subr.mxu1 %v840_v34  ;;  %v830_v59 = vld [vmem:[#allocation2 + $0x1a8] sm:$0xff] }
  0xf2   : > { %1432 = vtanh.f32 %v405_v60  ;;  %v829_v60 = vld [vmem:[#allocation2 + $0x1a0] sm:$0xff] }
  0xf3   : > { %1434 = vtanh.f32 %v409_v61  ;;  %v828_v61 = vld [vmem:[#allocation2 + $0x198] sm:$0xff] }
  0xf4   : > { %1436 = vtanh.f32 %v403_v62  ;;  %v827_v62 = vld [vmem:[#allocation2 + $0x190] sm:$0xff] }
  0xfc   : > { %v1427_v37 = vpop.eup %1426 }
  0xfd   : > { %v1429_v38 = vpop.eup %1428  ;;  %1261 = vmatprep.mubr.f32.mxu0 %v1427_v37 }
  0xfe   : > { %1262 = vmatmul.mubr.f32.vlgmr.msra.gmra.mxu0 %v1429_v38  ;;  %v1431_v63 = vpop.eup %1430 }
  0xff   : > { %1300 = vmatpush3.msra.mxu0 %v730_v53  ;;  %v1433_v1 = vpop.eup %1432  ;;  %v836_v53 = vld [vmem:[#allocation2 + $0x1d8] sm:$0xff] }
 0x100   : > { %1301 = vmatprep.subr.mxu0 %v729_v54  ;;  %v1614_v2 = vpop.eup %1434 }
 0x101   : > { %1302 = vmatpush3.msra.mxu0 %v729_v54  ;;  %v1617_v4 = vsub.f32 %v1431_v63, %v1614_v2  ;;  %v1619_v6 = vpop.eup %1436  ;;  %v835_v54 = vld [vmem:[#allocation2 + $0x1d0] sm:$0xff]  ;;  %v826_v63 = vld [vmem:[#allocation2 + $0x188] sm:$0xff] }
 0x102   : > { %v1622_v8 = vsub.f32 %v1433_v1, %v1619_v6  ;;  %1303 = vmatprep.subr.mxu0 %v728_v20  ;;  %v949_v1 = vld [vmem:[%s1729_s5 + $0x78] sm:$0xff] }
 0x103   : > { %1304 = vmatpush3.msra.mxu0 %v728_v20 }
 0x104   : > { %1305 = vmatprep.subr.mxu0 %v727_v21 }
 0x105   : > { %1306 = vmatpush3.msra.mxu0 %v727_v21 }
 0x106   : > { %1307 = vmatprep.subr.mxu0 %v726_v22 }
 0x107   : > { %1308 = vmatpush3.msra.mxu0 %v726_v22  ;;  %v947_v22 = vld [vmem:[%s1729_s5 + $0x68] sm:$0xff] }
 0x108   : > { %1309 = vmatprep.subr.mxu0 %v725_v23 }
 0x109   : > { %1310 = vmatpush3.msra.mxu0 %v725_v23  ;;  %v946_v23 = vld [vmem:[%s1729_s5 + $0x60] sm:$0xff] }
 0x10a   : > { %1311 = vmatprep.subr.mxu0 %v724_v24 }
 0x10b   : > { %1312 = vmatpush3.msra.mxu0 %v724_v24  ;;  %v945_v24 = vld [vmem:[%s1729_s5 + $0x58] sm:$0xff] }
 0x10c   : > { %1313 = vmatprep.subr.mxu0 %v723_v25 }
 0x10d   : > { %1314 = vmatpush3.msra.mxu0 %v723_v25  ;;  %v944_v25 = vld [vmem:[%s1729_s5 + $0x50] sm:$0xff] }
 0x10e   : > { %1315 = vmatprep.subr.mxu0 %v722_v26 }
 0x10f   : > { %1316 = vmatpush3.msra.mxu0 %v722_v26  ;;  %v943_v26 = vld [vmem:[%s1729_s5 + $0x48] sm:$0xff] }
 0x110   : > { %1317 = vmatprep.subr.mxu0 %v721_v27 }
 0x111   : > { %1318 = vmatpush3.msra.mxu0 %v721_v27  ;;  %v942_v27 = vld [vmem:[%s1729_s5 + $0x40] sm:$0xff] }
 0x112   : > { %1319 = vmatprep.subr.mxu0 %v720_v28 }
 0x113   : > { %1320 = vmatpush3.msra.mxu0 %v720_v28  ;;  %v941_v28 = vld [vmem:[%s1729_s5 + $0x38] sm:$0xff] }
 0x114   : > { %1321 = vmatprep.subr.mxu0 %v719_v29 }
 0x115   : > { %1322 = vmatpush3.msra.mxu0 %v719_v29  ;;  %v940_v29 = vld [vmem:[%s1729_s5 + $0x30] sm:$0xff] }
 0x116   : > { %1323 = vmatprep.subr.mxu0 %v718_v30 }
 0x117   : > { %1324 = vmatpush3.msra.mxu0 %v718_v30  ;;  %v939_v30 = vld [vmem:[%s1729_s5 + $0x28] sm:$0xff] }
 0x118   : > { %1325 = vmatprep.subr.mxu0 %v717_v31 }
 0x119   : > { %1326 = vmatpush3.msra.mxu0 %v717_v31  ;;  %v938_v31 = vld [vmem:[%s1729_s5 + $0x20] sm:$0xff] }
 0x11a   : > { %1327 = vmatprep.subr.mxu0 %v716_v32 }
 0x11b   : > { %1328 = vmatpush3.msra.mxu0 %v716_v32  ;;  %v937_v32 = vld [vmem:[%s1729_s5 + $0x18] sm:$0xff] }
 0x11c   : > { %1329 = vmatprep.subr.mxu0 %v715_v33 }
 0x11d   : > { %1330 = vmatpush3.msra.mxu0 %v715_v33  ;;  %v936_v33 = vld [vmem:[%s1729_s5 + $0x10] sm:$0xff] }
 0x11e   : > { %1369 = vmatprep.subr.mxu0 %v949_v1 }
 0x1be   : > { %v1263_v3 = vpop.f32.mrf.mxu0 }
 0x1bf   : > { %v591_v5 = vadd.f32 %v1263_v3, %v1121_v0  ;;  %v948_v3 = vld [vmem:[%s1729_s5 + $0x70] sm:$0xff] }
 0x1c0   : > { %v585_v7 = vpop.f32.mrf.mxu0 }
 0x1c1   : > { %v595_v9 = vmul.f32 %v591_v5, %v1617_v4  ;;  %v586_v10 = vadd.f32 %v1121_v0, %v585_v7  ;;  %v825_v0 = vld [vmem:[#allocation2 + $0x180] sm:$0xff] }
 0x1c2   : > { %v1125_v5 = vld [vmem:[%s1728_s4 + $0x2] ss:$0 sm:$0xff] }
 0x1c3   : > { %v597_v11 = vadd.f32 %v1614_v2, %v595_v9  ;;  %v594_v12 = vmul.f32 %v586_v10, %v1622_v8 }
 0x1c5   : > { %1438 = vtanh.f32 %v597_v11  ;;  %v596_v13 = vadd.f32 %v1619_v6, %v594_v12 }
 0x1c7   : > { %1440 = vtanh.f32 %v596_v13 }
 0x1d2   : > { %v1439_v14 = vpop.eup %1438 }
 0x1d3   : > { %v601_v16 = vmul.f32 %v1439_v14, %v1617_v4 }
 0x1d4   : > { %v1441_v15 = vpop.eup %1440 }
 0x1d5   : > { %v600_v17 = vmul.f32 %v1441_v15, %v1622_v8  ;;  %v603_v19 = vadd.f32 %v1614_v2, %v601_v16 }
 0x1d7   : > { %v602_v18 = vadd.f32 %v1619_v6, %v600_v17 }
 0x1d9   : > { %1296 = vmatprep.mubr.f32.mxu1 %v602_v18 }
 0x1da   : > { %1297 = vmatmul.mubr.f32.vlgmr.msra.gmra.mxu1 %v603_v19 }
 0x1db   : > { %1335 = vmatpush3.msra.mxu1 %v840_v34  ;;  %v935_v34 = vld [vmem:[%s1729_s5 + $0x8] sm:$0xff] }
 0x1dc   : > { %1336 = vmatprep.subr.mxu1 %v839_v35 }
 0x1dd   : > { %1337 = vmatpush3.msra.mxu1 %v839_v35  ;;  %v934_v35 = vld [vmem:[%s1729_s5] sm:$0xff] }
 0x1de   : > { %1338 = vmatprep.subr.mxu1 %v838_v51 }
 0x1df   : > { %1339 = vmatpush3.msra.mxu1 %v838_v51 }
 0x1e0   : > { %1340 = vmatprep.subr.mxu1 %v837_v52 }
 0x1e1   : > { %1341 = vmatpush3.msra.mxu1 %v837_v52  ;;  %v1128_v52 = vld [vmem:[%s1730_s6] ss:$0 sm:$0xff] }
 0x1e2   : > { %1342 = vmatprep.subr.mxu1 %v836_v53 }
 0x1e3   : > { %1343 = vmatpush3.msra.mxu1 %v836_v53 }
 0x1e4   : > { %1344 = vmatprep.subr.mxu1 %v835_v54 }
 0x1e5   : > { %1345 = vmatpush3.msra.mxu1 %v835_v54 }
 0x1e6   : > { %1346 = vmatprep.subr.mxu1 %v834_v55 }
 0x1e7   : > { %1347 = vmatpush3.msra.mxu1 %v834_v55 }
 0x1e8   : > { %1348 = vmatprep.subr.mxu1 %v833_v56 }
 0x1e9   : > { %1349 = vmatpush3.msra.mxu1 %v833_v56 }
 0x1ea   : > { %1350 = vmatprep.subr.mxu1 %v832_v57 }
 0x1eb   : > { %1351 = vmatpush3.msra.mxu1 %v832_v57 }
 0x1ec   : > { %1352 = vmatprep.subr.mxu1 %v831_v58 }
 0x1ed   : > { %1353 = vmatpush3.msra.mxu1 %v831_v58 }
 0x1ee   : > { %1354 = vmatprep.subr.mxu1 %v830_v59 }
 0x1ef   : > { %1355 = vmatpush3.msra.mxu1 %v830_v59 }
 0x1f0   : > { %1356 = vmatprep.subr.mxu1 %v829_v60 }
 0x1f1   : > { %1357 = vmatpush3.msra.mxu1 %v829_v60 }
 0x1f2   : > { %1358 = vmatprep.subr.mxu1 %v828_v61 }
 0x1f3   : > { %1359 = vmatpush3.msra.mxu1 %v828_v61 }
 0x1f4   : > { %1360 = vmatprep.subr.mxu1 %v827_v62 }
 0x1f5   : > { %1361 = vmatpush3.msra.mxu1 %v827_v62 }
 0x1f6   : > { %1362 = vmatprep.subr.mxu1 %v826_v63 }
 0x1f7   : > { %1363 = vmatpush3.msra.mxu1 %v826_v63 }
 0x1f8   : > { %1364 = vmatprep.subr.mxu1 %v825_v0 }
 0x1f9   : > { %1365 = vmatpush3.msra.mxu1 %v825_v0 }
 0x29a   : > { %v1298_v37 = vpop.f32.mrf.mxu1 }
 0x29b   : > { %v701_v38 = vadd.f32 %v1298_v37, %v1123_v36 }
 0x29c   : > { %v695_v39 = vpop.f32.mrf.mxu1 }
 0x29d   : > { %v705_v40 = vmul.f32 %v701_v38, %v1617_v4  ;;  %v696_v41 = vadd.f32 %v1123_v36, %v695_v39  ;;  %v1127_v36 = vld [vmem:[%s1728_s4 + $0x3] ss:$0 sm:$0xff] }
 0x29f   : > { %v707_v42 = vadd.f32 %v1614_v2, %v705_v40  ;;  %v704_v43 = vmul.f32 %v696_v41, %v1622_v8 }
 0x2a1   : > { %1442 = vtanh.f32 %v707_v42  ;;  %v706_v44 = vadd.f32 %v1619_v6, %v704_v43 }
 0x2a3   : > { %1444 = vtanh.f32 %v706_v44 }
 0x2ae   : > { %v1443_v45 = vpop.eup %1442 }
 0x2af   : > { %v711_v47 = vmul.f32 %v1443_v45, %v1617_v4 }
 0x2b0   : > { %v1445_v46 = vpop.eup %1444 }
 0x2b1   : > { %v710_v48 = vmul.f32 %v1445_v46, %v1622_v8  ;;  %v713_v50 = vadd.f32 %v1614_v2, %v711_v47 }
 0x2b3   : > { %v712_v49 = vadd.f32 %v1619_v6, %v710_v48 }
 0x2b5   : > { %1331 = vmatprep.mubr.f32.mxu0 %v712_v49 }
 0x2b6   : > { %1332 = vmatmul.mubr.f32.vlgmr.msra.gmra.mxu0 %v713_v50 }
 0x2b7   : > { %1370 = vmatpush3.msra.mxu0 %v949_v1 }
 0x2b8   : > { %1371 = vmatprep.subr.mxu0 %v948_v3 }
 0x2b9   : > { %1372 = vmatpush3.msra.mxu0 %v948_v3 }
 0x2ba   : > { %1373 = vmatprep.subr.mxu0 %v947_v22 }
 0x2bb   : > { %1374 = vmatpush3.msra.mxu0 %v947_v22 }
 0x2bc   : > { %1375 = vmatprep.subr.mxu0 %v946_v23 }
 0x2bd   : > { %1376 = vmatpush3.msra.mxu0 %v946_v23 }
 0x2be   : > { %1377 = vmatprep.subr.mxu0 %v945_v24 }
 0x2bf   : > { %1378 = vmatpush3.msra.mxu0 %v945_v24 }
 0x2c0   : > { %1379 = vmatprep.subr.mxu0 %v944_v25 }
 0x2c1   : > { %1380 = vmatpush3.msra.mxu0 %v944_v25 }
 0x2c2   : > { %1381 = vmatprep.subr.mxu0 %v943_v26 }
 0x2c3   : > { %1382 = vmatpush3.msra.mxu0 %v943_v26 }
 0x2c4   : > { %1383 = vmatprep.subr.mxu0 %v942_v27 }
 0x2c5   : > { %1384 = vmatpush3.msra.mxu0 %v942_v27 }
 0x2c6   : > { %1385 = vmatprep.subr.mxu0 %v941_v28 }
 0x2c7   : > { %1386 = vmatpush3.msra.mxu0 %v941_v28 }
 0x2c8   : > { %1387 = vmatprep.subr.mxu0 %v940_v29 }
 0x2c9   : > { %1388 = vmatpush3.msra.mxu0 %v940_v29 }
 0x2ca   : > { %1389 = vmatprep.subr.mxu0 %v939_v30 }
 0x2cb   : > { %1390 = vmatpush3.msra.mxu0 %v939_v30 }
 0x2cc   : > { %1391 = vmatprep.subr.mxu0 %v938_v31 }
 0x2cd   : > { %1392 = vmatpush3.msra.mxu0 %v938_v31 }
 0x2ce   : > { %1393 = vmatprep.subr.mxu0 %v937_v32 }
 0x2cf   : > { %1394 = vmatpush3.msra.mxu0 %v937_v32 }
 0x2d0   : > { %1395 = vmatprep.subr.mxu0 %v936_v33 }
 0x2d1   : > { %1396 = vmatpush3.msra.mxu0 %v936_v33 }
 0x2d2   : > { %1397 = vmatprep.subr.mxu0 %v935_v34 }
 0x2d3   : > { %1398 = vmatpush3.msra.mxu0 %v935_v34 }
 0x2d4   : > { %1399 = vmatprep.subr.mxu0 %v934_v35 }
 0x2d5   : > { %1400 = vmatpush3.msra.mxu0 %v934_v35 }
 0x376   : > { %v1333_v7 = vpop.f32.mrf.mxu0 }
 0x377   : > { %v811_v9 = vadd.f32 %v1333_v7, %v1125_v5 }
 0x378   : > { %v805_v10 = vpop.f32.mrf.mxu0 }
 0x379   : > { %v815_v11 = vmul.f32 %v811_v9, %v1617_v4  ;;  %v806_v12 = vadd.f32 %v1125_v5, %v805_v10 }
 0x37b   : > { %v817_v13 = vadd.f32 %v1614_v2, %v815_v11  ;;  %v814_v14 = vmul.f32 %v806_v12, %v1622_v8 }
 0x37d   : > { %1446 = vtanh.f32 %v817_v13  ;;  %v816_v15 = vadd.f32 %v1619_v6, %v814_v14 }
 0x37f   : > { %1448 = vtanh.f32 %v816_v15 }
 0x38a   : > { %v1447_v16 = vpop.eup %1446 }
 0x38b   : > { %v821_v18 = vmul.f32 %v1447_v16, %v1617_v4 }
 0x38c   : > { %v1449_v17 = vpop.eup %1448 }
 0x38d   : > { %v820_v19 = vmul.f32 %v1449_v17, %v1622_v8  ;;  %v823_v21 = vadd.f32 %v1614_v2, %v821_v18 }
 0x38f   : > { %v822_v20 = vadd.f32 %v1619_v6, %v820_v19 }
 0x391   : > { %1366 = vmatprep.mubr.f32.mxu1 %v822_v20 }
 0x392   : > { %1367 = vmatmul.mubr.f32.vlgmr.msra.gmra.mxu1 %v823_v21 }
 0x452   : > { %v1368_v37 = vpop.f32.mrf.mxu1 }
 0x453   : > { %v921_v38 = vadd.f32 %v1368_v37, %v1127_v36 }
 0x454   : > { %v915_v39 = vpop.f32.mrf.mxu1 }
 0x455   : > { %v925_v40 = vmul.f32 %v921_v38, %v1617_v4  ;;  %v916_v41 = vadd.f32 %v1127_v36, %v915_v39 }
 0x457   : > { %v927_v42 = vadd.f32 %v1614_v2, %v925_v40  ;;  %v924_v43 = vmul.f32 %v916_v41, %v1622_v8 }
 0x459   : > { %1450 = vtanh.f32 %v927_v42  ;;  %v926_v44 = vadd.f32 %v1619_v6, %v924_v43 }
 0x45b   : > { %1452 = vtanh.f32 %v926_v44 }
 0x466   : > { %v1451_v45 = vpop.eup %1450 }
 0x467   : > { %v931_v47 = vmul.f32 %v1451_v45, %v1617_v4 }
 0x468   : > { %v1453_v46 = vpop.eup %1452 }
 0x469   : > { %v930_v48 = vmul.f32 %v1453_v46, %v1622_v8  ;;  %v933_v50 = vadd.f32 %v1614_v2, %v931_v47 }
 0x46b   : > { %v932_v49 = vadd.f32 %v1619_v6, %v930_v48 }
 0x46d   : > { %1401 = vmatprep.mubr.f32.mxu0 %v932_v49 }
 0x46e   : > { %1402 = vmatmul.mubr.f32.vlgmr.msra.gmra.mxu0 %v933_v50 }
 0x52e   : > { %v1403_v51 = vpop.f32.mrf.mxu0 }
 0x52f   : > { %v1029_v8 = vadd.f32 %v1403_v51, %v1128_v52 }
 0x530   : > { %v1023_v53 = vpop.f32.mrf.mxu0 }
 0x531   : > { %v1024_v4 = vadd.f32 %v1128_v52, %v1023_v53  ;;  %1034 = vst.msk [vmem:[%s295_s30 + $0x8] sm:$0xff] %vm1032_vm2, %v1029_v8 }
 0x533   : > { %1033 = vst.msk [vmem:[%s295_s30] sm:$0xff] %vm1032_vm2, %v1024_v4 }
 0x534 PF: > { %s18_s24 = sadd.s32 1, %s1490_s24  }
 0x535   : > { %p15_p1 = scmp.ge.s32.totalorder %s18_s24, 4  }
 0x537   :  { %17 = sbr.rel (!%p15_p1) target bundleno = 1 (0x1), region = 89 }
 0x53c   :  { %1057 = vsyncpa [#allocation3], 1 }
 0x53d   :  { %1059 = vsyncpa [#allocation3 + $0x1], 1 }

</bundles_post_ra>
